<compile_context>
chip_gen: v5e
topology: v5e:2x2
jax: 0.10.0
libtpu: 0.0.40
codegen_flags: <defaults>
</compile_context>

<pallas_src>
import functools

import jax
import jax.numpy as jnp
from jax.experimental import pallas as pl
from jax.experimental.pallas import tpu as pltpu


HIDDEN = 32
NUM_LAYERS = 5
LAYER_DIMS = [(2, HIDDEN), (HIDDEN, HIDDEN), (HIDDEN, HIDDEN),
              (HIDDEN, HIDDEN), (HIDDEN, 1)]  # (fan_in, fan_out) per layer


def _eup_supports_bf16():
    """True on chips with a bf16-capable VPU/EUP (v6e, v7x); False on <=v5."""
    try:
        kind = jax.devices()[0].device_kind.lower()
    except Exception:  # pragma: no cover - be conservative
        return False
    return not any(tag in kind for tag in ("v2", "v3", "v4", "v5"))


def mlp_kernel(x_ref, w1_ref, wp_ref, bp_ref, o_ref, *, act_dtype):
    # x_ref : (tb, 2)   f32   batch tile of x in its natural torch layout
    # w1_ref: (32, 2)   f32   layer-1 weight (torch layout: (out, in))
    # wp_ref: (128, 32) bf16  W2..W4 stacked in 32-row blocks, W5 in row 96
    # bp_ref: (160, 1)  f32   b1..b4 stacked in 32-row blocks, b5 at row 128
    # o_ref : (1, tb)   f32   lane-dense output tile
    #
    # Layer 1: contract the size-2 feature dim of both operands (trans_b form)
    # -> (32, tb) feature-major result directly on the MXU; avoids any
    # wrapper-side transpose / extra HBM pass over x.
    acc = jax.lax.dot_general(
        w1_ref[...], x_ref[...], (((1,), (1,)), ((), ())),
        preferred_element_type=jnp.float32)
    acc = acc + bp_ref[0:32, :]                         # f32 bias-add (broadcast on lanes)
    h = jnp.tanh(acc.astype(act_dtype)).astype(jnp.bfloat16)

    # Hidden layers 2..4: bf16 MXU operands, f32 accumulation, f32 bias-add,
    # tanh on the EUP (bf16 on v6e/v7x, f32 on v5e).
    for l in range(3):
        w = wp_ref[32 * l:32 * (l + 1), :]              # (32, 32) bf16
        b = bp_ref[32 * (l + 1):32 * (l + 2), :]        # (32, 1)  f32
        acc = jnp.dot(w, h, preferred_element_type=jnp.float32) + b
        h = jnp.tanh(acc.astype(act_dtype)).astype(jnp.bfloat16)

    # Output layer (no activation): (1,32) @ (32,tb) -> (1,tb) lane-dense store.
    w5 = wp_ref[96:97, :]                               # (1, 32) bf16
    b5 = bp_ref[128:129, :]                             # (1, 1)  f32
    o_ref[...] = (jnp.dot(w5, h, preferred_element_type=jnp.float32) + b5
                  ).astype(o_ref.dtype)


def pack_params(params):
    """Pack torch-layout params (W (out,in), b (out,)) once at init.

    Returns (w1_f32, w_pack_bf16, b_pack_f32) resident buffers for the kernel.
    """
    w1 = params[0][0].astype(jnp.float32)                       # (32, 2)
    w_pack = jnp.zeros(((NUM_LAYERS - 1) * HIDDEN, HIDDEN), jnp.float32)
    for l in range(1, NUM_LAYERS):
        w = params[l][0]
        r0 = HIDDEN * (l - 1)
        w_pack = w_pack.at[r0:r0 + w.shape[0], :w.shape[1]].set(w)
    b_pack = jnp.zeros((NUM_LAYERS * HIDDEN, 1), jnp.float32)
    for l, (_, b) in enumerate(params):
        r0 = HIDDEN * l
        b_pack = b_pack.at[r0:r0 + b.shape[0], 0].set(b)
    return w1, w_pack.astype(jnp.bfloat16), b_pack


def mlp_forward(x, packed, *, block_b=4096):
    """x: [B, 2] f32.  packed: output of pack_params().  Returns [B, 1] f32."""
    w1, w_pack, b_pack = packed
    B = x.shape[0]
    assert x.shape[1] == 2

    # Batch tile: force a multiple of 128 lanes (BlockSpec last-dim rule) and
    # cap at the padded batch; big default amortizes per-grid-step overhead.
    block_b = max(128, (block_b // 128) * 128)
    lanes = 128 * pl.cdiv(B, 128)
    tb = min(block_b, lanes)
    # v7x megacore: if one tile would cover the whole (>=256-lane) batch, split
    # into two balanced tiles so "parallel" has >=2 grid steps to shard.
    if tb == lanes and lanes >= 2 * 128:
        tb = 128 * pl.cdiv(lanes // 128, 2)
    grid = (pl.cdiv(B, tb),)

    act_dtype = jnp.bfloat16 if _eup_supports_bf16() else jnp.float32
    kernel = functools.partial(mlp_kernel, act_dtype=act_dtype)

    # Advisory cost estimate for XLA's scheduler.
    param_bytes = int(w1.size) * 4 + int(w_pack.size) * 2 + int(b_pack.size) * 4
    flops = 2 * B * sum(fi * fo for fi, fo in LAYER_DIMS)
    cost = pl.CostEstimate(
        flops=flops,
        transcendentals=4 * HIDDEN * B,          # 4 tanh layers x 32 features
        bytes_accessed=4 * (2 * B + B) + param_bytes,
    )

    out = pl.pallas_call(
        kernel,
        out_shape=jax.ShapeDtypeStruct((1, B), jnp.float32),
        grid=grid,
        in_specs=[
            pl.BlockSpec((tb, 2), lambda i: (i, 0)),            # x batch tile
            pl.BlockSpec((HIDDEN, 2), lambda i: (0, 0)),        # resident W1
            pl.BlockSpec(w_pack.shape, lambda i: (0, 0)),       # resident W2..W5
            pl.BlockSpec(b_pack.shape, lambda i: (0, 0)),       # resident biases
        ],
        out_specs=pl.BlockSpec((1, tb), lambda i: (0, i)),
        compiler_params=pltpu.CompilerParams(
            # Batch tiles are independent -> shard across both TCs on v7x.
            dimension_semantics=("parallel",)),
        cost_estimate=cost,
    )(x, w1, w_pack, b_pack)

    return out.T  # (1, B) -> (B, 1); free reshape


def init_params(key):
    """Deterministic init matching torch.nn.Linear layouts: W (out, in), b (out,)."""
    params = []
    for i, (fan_in, fan_out) in enumerate(LAYER_DIMS):
        kw, kb = jax.random.split(jax.random.fold_in(key, i))
        bound = 1.0 / jnp.sqrt(fan_in)  # torch.nn.Linear default init range
        w = jax.random.uniform(kw, (fan_out, fan_in), jnp.float32, -bound, bound)
        b = jax.random.uniform(kb, (fan_out,), jnp.float32, -bound, bound)
        params.append((w, b))
    return params


def reference_forward(x, params):
    """Pure-JAX f32 reference with torch.nn.Linear semantics (x @ W.T + b)."""
    h = x
    for i, (w, b) in enumerate(params):
        h = h @ w.T + b
        if i < len(params) - 1:
            h = jnp.tanh(h)
    return h


if __name__ == "__main__":
    key = jax.random.PRNGKey(0)
    kx, kp = jax.random.split(key)
    params = init_params(kp)
    packed = pack_params(params)

    # Tolerances are loosened vs. the pure-f32 reference because layers 2..5
    # use bf16 MXU operands (f32 accumulation); observed error is ~1e-2.
    TOL = dict(atol=2e-2, rtol=2e-2)

    # Small batch: single 128-lane tile, partial (ragged) blocks.
    B = 8
    x = jax.random.normal(kx, (B, 2), dtype=jnp.float32)
    out = jax.block_until_ready(mlp_forward(x, params and packed))
    ref = reference_forward(x, params)
    assert out.shape == (B, 1)
    assert jnp.allclose(out, ref, **TOL)

    # Larger, non-multiple-of-128 batch: exercises block_b rounding, the
    # two-way tile split (>=2 "parallel" grid steps), resident packed weights,
    # double-buffered x/out tiles, and the ragged final block.
    B2 = 300
    x2 = jax.random.normal(jax.random.fold_in(kx, 1), (B2, 2), dtype=jnp.float32)
    out2 = jax.block_until_ready(mlp_forward(x2, packed, block_b=1000))
    ref2 = reference_forward(x2, params)
    assert out2.shape == (B2, 1)
    assert jnp.allclose(out2, ref2, **TOL)

    print("KERNEL_OK")
</pallas_src>

<mosaic_0001>
module attributes {stable_mosaic.version = 11 : i64} {
  func.func @mlp_kernel(%arg0: i32, %arg1: memref<128x2xf32, #tpu.memory_space<vmem>>, %arg2: memref<32x2xf32, #tpu.memory_space<vmem>>, %arg3: memref<128x32xbf16, #tpu.memory_space<vmem>>, %arg4: memref<160x1xf32, #tpu.memory_space<vmem>>, %arg5: memref<1x128xf32, #tpu.memory_space<vmem>>) attributes {dimension_semantics = [#tpu.dimension_semantics<parallel>], iteration_bounds = array<i64: 1>, scalar_prefetch = 0 : i64, scratch_operands = 0 : i64, tpu.core_type = #tpu.core_type<tc>, window_params = [{transform_indices = @transform_0, window_bounds = array<i64: 128, 2>}, {pipeline_mode = #tpu.pipeline_mode<synchronous>, transform_indices = @transform_1, window_bounds = array<i64: 32, 2>}, {pipeline_mode = #tpu.pipeline_mode<synchronous>, transform_indices = @transform_2, window_bounds = array<i64: 128, 32>}, {pipeline_mode = #tpu.pipeline_mode<synchronous>, transform_indices = @transform_3, window_bounds = array<i64: 160, 1>}, {transform_indices = @transform_4, window_bounds = array<i64: 1, 128>}]} {
    %c0 = arith.constant 0 : index
    %c0_0 = arith.constant 0 : index
    %0 = vector.load %arg2[%c0, %c0_0] : memref<32x2xf32, #tpu.memory_space<vmem>>, vector<32x2xf32>
    %c0_1 = arith.constant 0 : index
    %c0_2 = arith.constant 0 : index
    %1 = vector.load %arg1[%c0_1, %c0_2] : memref<128x2xf32, #tpu.memory_space<vmem>>, vector<128x2xf32>
    %cst = arith.constant dense<0.000000e+00> : vector<32x128xf32>
    %2 = tpu.matmul %0, %1, %cst {dimension_numbers = #tpu.dot_dimension_numbers<[1], [1], [0], [0], [0, 0, 1, 0], [], []>} : vector<32x2xf32>, vector<128x2xf32>, vector<32x128xf32> -> vector<32x128xf32>
    %c0_3 = arith.constant 0 : index
    %c0_4 = arith.constant 0 : index
    %3 = vector.load %arg4[%c0_3, %c0_4] : memref<160x1xf32, #tpu.memory_space<vmem>>, vector<32x1xf32>
    %4 = vector.broadcast %3 : vector<32x1xf32> to vector<32x128xf32>
    %5 = arith.addf %2, %4 : vector<32x128xf32>
    %6 = arith.truncf %5 : vector<32x128xf32> to vector<32x128xbf16>
    %7 = math.tanh %6 : vector<32x128xbf16>
    %c0_5 = arith.constant 0 : index
    %c0_6 = arith.constant 0 : index
    %8 = vector.load %arg3[%c0_5, %c0_6] : memref<128x32xbf16, #tpu.memory_space<vmem>>, vector<32x32xbf16>
    %c32 = arith.constant 32 : index
    %c0_7 = arith.constant 0 : index
    %9 = vector.load %arg4[%c32, %c0_7] : memref<160x1xf32, #tpu.memory_space<vmem>>, vector<32x1xf32>
    %cst_8 = arith.constant dense<0.000000e+00> : vector<32x128xf32>
    %10 = tpu.matmul %8, %7, %cst_8 {dimension_numbers = #tpu.dot_dimension_numbers<[1], [0], [0], [1], [0, 0, 1, 1], [], []>} : vector<32x32xbf16>, vector<32x128xbf16>, vector<32x128xf32> -> vector<32x128xf32>
    %11 = vector.broadcast %9 : vector<32x1xf32> to vector<32x128xf32>
    %12 = arith.addf %10, %11 : vector<32x128xf32>
    %13 = arith.truncf %12 : vector<32x128xf32> to vector<32x128xbf16>
    %14 = math.tanh %13 : vector<32x128xbf16>
    %c32_9 = arith.constant 32 : index
    %c0_10 = arith.constant 0 : index
    %15 = vector.load %arg3[%c32_9, %c0_10] : memref<128x32xbf16, #tpu.memory_space<vmem>>, vector<32x32xbf16>
    %c64 = arith.constant 64 : index
    %c0_11 = arith.constant 0 : index
    %16 = vector.load %arg4[%c64, %c0_11] : memref<160x1xf32, #tpu.memory_space<vmem>>, vector<32x1xf32>
    %cst_12 = arith.constant dense<0.000000e+00> : vector<32x128xf32>
    %17 = tpu.matmul %15, %14, %cst_12 {dimension_numbers = #tpu.dot_dimension_numbers<[1], [0], [0], [1], [0, 0, 1, 1], [], []>} : vector<32x32xbf16>, vector<32x128xbf16>, vector<32x128xf32> -> vector<32x128xf32>
    %18 = vector.broadcast %16 : vector<32x1xf32> to vector<32x128xf32>
    %19 = arith.addf %17, %18 : vector<32x128xf32>
    %20 = arith.truncf %19 : vector<32x128xf32> to vector<32x128xbf16>
    %21 = math.tanh %20 : vector<32x128xbf16>
    %c64_13 = arith.constant 64 : index
    %c0_14 = arith.constant 0 : index
    %22 = vector.load %arg3[%c64_13, %c0_14] : memref<128x32xbf16, #tpu.memory_space<vmem>>, vector<32x32xbf16>
    %c96 = arith.constant 96 : index
    %c0_15 = arith.constant 0 : index
    %23 = vector.load %arg4[%c96, %c0_15] : memref<160x1xf32, #tpu.memory_space<vmem>>, vector<32x1xf32>
    %cst_16 = arith.constant dense<0.000000e+00> : vector<32x128xf32>
    %24 = tpu.matmul %22, %21, %cst_16 {dimension_numbers = #tpu.dot_dimension_numbers<[1], [0], [0], [1], [0, 0, 1, 1], [], []>} : vector<32x32xbf16>, vector<32x128xbf16>, vector<32x128xf32> -> vector<32x128xf32>
    %25 = vector.broadcast %23 : vector<32x1xf32> to vector<32x128xf32>
    %26 = arith.addf %24, %25 : vector<32x128xf32>
    %27 = arith.truncf %26 : vector<32x128xf32> to vector<32x128xbf16>
    %28 = math.tanh %27 : vector<32x128xbf16>
    %c96_17 = arith.constant 96 : index
    %c0_18 = arith.constant 0 : index
    %29 = vector.load %arg3[%c96_17, %c0_18] : memref<128x32xbf16, #tpu.memory_space<vmem>>, vector<1x32xbf16>
    %c128 = arith.constant 128 : index
    %c0_19 = arith.constant 0 : index
    %30 = vector.load %arg4[%c128, %c0_19] : memref<160x1xf32, #tpu.memory_space<vmem>>, vector<1x1xf32>
    %cst_20 = arith.constant dense<0.000000e+00> : vector<1x128xf32>
    %31 = tpu.matmul %29, %28, %cst_20 {dimension_numbers = #tpu.dot_dimension_numbers<[1], [0], [0], [1], [0, 0, 1, 1], [], []>} : vector<1x32xbf16>, vector<32x128xbf16>, vector<1x128xf32> -> vector<1x128xf32>
    %32 = vector.broadcast %30 : vector<1x1xf32> to vector<1x128xf32>
    %33 = arith.addf %31, %32 : vector<1x128xf32>
    %c0_21 = arith.constant 0 : index
    %c0_22 = arith.constant 0 : index
    %34 = vector.load %arg5[%c0_21, %c0_22] : memref<1x128xf32, #tpu.memory_space<vmem>>, vector<1x128xf32>
    tpu.vector_store %arg5[%c0_21, %c0_22], %33 {strides = array<i32>} : memref<1x128xf32, #tpu.memory_space<vmem>>, vector<1x128xf32>,
    return
  }
  func.func @transform_0(%arg0: i32) -> (i32, i32) {
    %c0_i32 = arith.constant 0 : i32
    %c0_i32_0 = arith.constant 0 : i32
    return %arg0, %c0_i32 : i32, i32
  }
  func.func @transform_1(%arg0: i32) -> (i32, i32) {
    %c0_i32 = arith.constant 0 : i32
    %c0_i32_0 = arith.constant 0 : i32
    %c0_i32_1 = arith.constant 0 : i32
    return %c0_i32, %c0_i32_0 : i32, i32
  }
  func.func @transform_2(%arg0: i32) -> (i32, i32) {
    %c0_i32 = arith.constant 0 : i32
    %c0_i32_0 = arith.constant 0 : i32
    %c0_i32_1 = arith.constant 0 : i32
    return %c0_i32, %c0_i32_0 : i32, i32
  }
  func.func @transform_3(%arg0: i32) -> (i32, i32) {
    %c0_i32 = arith.constant 0 : i32
    %c0_i32_0 = arith.constant 0 : i32
    %c0_i32_1 = arith.constant 0 : i32
    return %c0_i32, %c0_i32_0 : i32, i32
  }
  func.func @transform_4(%arg0: i32) -> (i32, i32) {
    %c0_i32 = arith.constant 0 : i32
    %c0_i32_0 = arith.constant 0 : i32
    return %c0_i32, %arg0 : i32, i32
  }
}

</mosaic_0001>

<bundles_post_ra>
// kernel: tpu_custom_call.1
= control target key start
LH: loop header
LB: loop body
LE: loop exit
PB: predicated region body
PF: predicated region fallthrough
CT: control target
= control target key end

     0   :  { %vm63_vm0 = vcmask 15360   ;;  %s740_s0 = inlined_call_operand.vmem [shape: f32[8,2], index: 0, kind: input, shape index: {}]   ;;  %s741_s1 = inlined_call_operand.vmem [shape: f32[32,2], index: 1, kind: input, shape index: {}]   ;;  %s742_s2 = inlined_call_operand.vmem [shape: bf16[128,32], index: 2, kind: input, shape index: {}]   ;;  %s743_s3 = inlined_call_operand.vmem [shape: f32[160,1], index: 3, kind: input, shape index: {}]   ;;  %s744_s4 = inlined_call_operand.hbm [shape: f32[1,8], index: 4, kind: output, shape index: {}]  }
   0x1   :  { %v38_v0 = vld [vmem:[%s740_s0 + $0x78] sm:$0xff]  ;;  %v37_v1 = vld [vmem:[%s740_s0 + $0x70] sm:$0xff] }
   0x2   :  { %431 = vmatpush.xpose.msk.msra.mxu0 %vm63_vm0, %v38_v0 }
   0x3   :  { %9 = vsyncpa [#allocation3], 0  ;;  %v36_v2 = vld [vmem:[%s740_s0 + $0x68] sm:$0xff]  ;;  %v35_v3 = vld [vmem:[%s740_s0 + $0x60] sm:$0xff]  ;;  %v551_v7 = vmov 0   ;;  %vm203_vm1 = vcmask 261120  }
   0x4   :  { %v34_v4 = vld [vmem:[%s740_s0 + $0x58] sm:$0xff]  ;;  %v41_v5 = vld [vmem:[%s743_s3 + $0x10] sm:$0xff]  ;;  %490 = vset.pattern.permute.xlu0 %v551_v7  ;;  %491 = vset.pattern.permute.xlu1 %v551_v7  ;;  %v39_v8 = vld [vmem:[%s743_s3] sm:$0xff]  ;;  %s552_s22 = smov [#allocation2]   ;;  %s422_s25 = sshll.u32 %s744_s4, 4  ;;  %s423_s25 = int_to_ptr.hbm [resolvable:$true] %s422_s25 }
   0x5   :  { %v33_v6 = vld [vmem:[%s740_s0 + $0x50] sm:$0xff]  ;;  %55 = vperm.xlu0 %490, %v41_v5   ;;  %492 = vset.pattern.permute.xlu2 %v551_v7  ;;  %v32_v9 = vld [vmem:[%s740_s0 + $0x48] sm:$0xff]  ;;  %v42_v10 = vld [vmem:[%s743_s3 + $0x18] sm:$0xff] }
   0x6   :  { %432 = vmatpush.xpose.msk.msra.mxu0 %vm63_vm0, %v37_v1  ;;  %45 = vperm.xlu1 %491, %v39_v8   ;;  %v31_v11 = vld [vmem:[%s740_s0 + $0x40] sm:$0xff]  ;;  %v40_v12 = vld [vmem:[%s743_s3 + $0x8] sm:$0xff]  ;;  %v30_v13 = vld [vmem:[%s740_s0 + $0x38] sm:$0xff] }
   0x7   :  { %v169_v14 = vld [vmem:[%s743_s3 + $0x20] sm:$0xff]  ;;  %v29_v15 = vld [vmem:[%s740_s0 + $0x30] sm:$0xff]  ;;  %v170_v16 = vld [vmem:[%s743_s3 + $0x28] sm:$0xff] }
   0x8   :  { %v28_v17 = vld [vmem:[%s740_s0 + $0x28] sm:$0xff]  ;;  %v248_v18 = vld [vmem:[%s743_s3 + $0x58] sm:$0xff]  ;;  %v27_v19 = vld [vmem:[%s740_s0 + $0x20] sm:$0xff] }
   0x9   :  { %v245_v20 = vld [vmem:[%s743_s3 + $0x40] sm:$0xff]  ;;  %v26_v21 = vld [vmem:[%s740_s0 + $0x18] sm:$0xff]  ;;  %v322_v22 = vld [vmem:[%s743_s3 + $0x70] sm:$0xff] }
   0xa   :  { %433 = vmatpush.xpose.msk.msra.mxu0 %vm63_vm0, %v36_v2  ;;  %v25_v23 = vld [vmem:[%s740_s0 + $0x10] sm:$0xff]  ;;  %v323_v24 = vld [vmem:[%s743_s3 + $0x78] sm:$0xff]  ;;  %v24_v25 = vld [vmem:[%s740_s0 + $0x8] sm:$0xff] }
   0xb   :  { %v321_v26 = vld [vmem:[%s743_s3 + $0x68] sm:$0xff]  ;;  %v23_v27 = vld [vmem:[%s740_s0] sm:$0xff]  ;;  %v21_v31 = vld [vmem:[%s741_s1 + $0x10] sm:$0xff]  ;;  %s420_s0 = sshll.u32 %s552_s22, 4  ;;  %s421_s0 = int_to_ptr.vmem [resolvable:$true] %s420_s0 }
   0xc   :  { %v392_v28 = vld [vmem:[%s743_s3 + $0x80] sm:$0x1]  ;;  %v20_v30 = vld [vmem:[%s741_s1 + $0x8] sm:$0xff]  ;;  %v22_v32 = vld [vmem:[%s741_s1 + $0x18] sm:$0xff] }
   0xd   :  { %60 = vperm.xlu0 %490, %v42_v10   ;;  %v19_v29 = vld [vmem:[%s741_s1] sm:$0xff]  ;;  %v171_v51 = vld [vmem:[%s743_s3 + $0x30] sm:$0xff]  ;;  %v172_v54 = vld [vmem:[%s743_s3 + $0x38] sm:$0xff] }
   0xe   :  { %434 = vmatpush.xpose.msk.msra.mxu0 %vm63_vm0, %v35_v3  ;;  %50 = vperm.xlu1 %491, %v40_v12   ;;  %v482_v59 = vld [vmem:[%s742_s2] sm:$0xff]  ;;  %v247_v60 = vld [vmem:[%s743_s3 + $0x50] sm:$0xff]  ;;  %v246_v61 = vld [vmem:[%s743_s3 + $0x48] sm:$0xff] }
   0xf   :  { %185 = vperm.xlu2 %492, %v171_v51   ;;  %v483_v62 = vld [vmem:[%s742_s2 + $0x8] sm:$0xff]  ;;  %v320_v63 = vld [vmem:[%s743_s3 + $0x60] sm:$0xff] }
  0x10   :  { %v487_v51 = vld [vmem:[%s742_s2 + $0x28] sm:$0xff] }
  0x12   :  { %435 = vmatpush.xpose.msk.msra.mxu0 %vm63_vm0, %v34_v4 }
  0x15   :  { %175 = vperm.xlu0 %490, %v169_v14  }
  0x16   :  { %436 = vmatpush.xpose.msk.msra.mxu0 %vm63_vm0, %v33_v6  ;;  %180 = vperm.xlu1 %491, %v170_v16  }
  0x17   :  { %190 = vperm.xlu2 %492, %v172_v54  }
  0x1a   :  { %437 = vmatpush.xpose.msk.msra.mxu0 %vm63_vm0, %v32_v9 }
  0x1d   :  { %266 = vperm.xlu0 %490, %v248_v18  }
  0x1e   :  { %438 = vmatpush.xpose.msk.msra.mxu0 %vm63_vm0, %v31_v11  ;;  %251 = vperm.xlu1 %491, %v245_v20  }
  0x1f   :  { %261 = vperm.xlu2 %492, %v247_v60  }
  0x22   :  { %439 = vmatpush.xpose.msk.msra.mxu0 %vm63_vm0, %v30_v13 }
  0x25   :  { %336 = vperm.xlu0 %490, %v322_v22  }
  0x26   :  { %440 = vmatpush.xpose.msk.msra.mxu0 %vm63_vm0, %v29_v15  ;;  %341 = vperm.xlu1 %491, %v323_v24   ;;  %v484_v24 = vld [vmem:[%s742_s2 + $0x10] sm:$0xff] }
  0x27   :  { %256 = vperm.xlu2 %492, %v246_v61  }
  0x2a   :  { %441 = vmatpush.xpose.msk.msra.mxu0 %vm63_vm0, %v28_v17 }
  0x2d   :  { %331 = vperm.xlu0 %490, %v321_v26  }
  0x2e   :  { %442 = vmatpush.xpose.msk.msra.mxu0 %vm63_vm0, %v27_v19  ;;  %395 = vperm.xlu1 %491, %v392_v28  }
  0x2f   :  { %326 = vperm.xlu2 %492, %v320_v63  }
  0x32   :  { %443 = vmatpush.xpose.msk.msra.mxu0 %vm63_vm0, %v26_v21 }
  0x36   :  { %444 = vmatpush.xpose.msk.msra.mxu0 %vm63_vm0, %v25_v23 }
  0x3a   :  { %445 = vmatpush.xpose.msk.msra.mxu0 %vm63_vm0, %v24_v25  ;;  %v485_v25 = vld [vmem:[%s742_s2 + $0x18] sm:$0xff] }
  0x3e   :  { %446 = vmatpush.xpose.msk.msra.mxu0 %vm63_vm0, %v23_v27 }
  0x41   :  { %447 = vmatmul.msk.f32.vlgmr.msra.gmra.mxu0 %vm63_vm0, %v19_v29 }
  0x49   :  { %448 = vmatmul.msk.f32.gmra.mxu0 %vm63_vm0, %v20_v30 }
  0x51   :  { %449 = vmatmul.msk.f32.gmra.mxu0 %vm63_vm0, %v21_v31 }
  0x59   :  { %450 = vmatmul.msk.f32.gmra.mxu0 %vm63_vm0, %v22_v32 }
  0x69   :  { %v186_v2 = vpop.permute.xlu2 %185 }
  0x71   :  { %v191_v8 = vpop.permute.xlu2 %190 }
  0x77   :  { %v56_v36 = vpop.permute.xlu0 %55 }
  0x78   :  { %v46_v35 = vpop.permute.xlu1 %45 }
  0x79   :  { %v262_v28 = vpop.permute.xlu2 %261 }
  0x7f   :  { %v61_v41 = vpop.permute.xlu0 %60 }
  0x80   :  { %v51_v38 = vpop.permute.xlu1 %50 }
  0x81   :  { %v257_v30 = vpop.permute.xlu2 %256 }
  0x87   :  { %v176_v6 = vpop.permute.xlu0 %175 }
  0x88   :  { %v181_v4 = vpop.permute.xlu1 %180 }
  0x90   :  { %v252_v32 = vpop.permute.xlu1 %251 }
  0x98   :  { %v342_v60 = vpop.permute.xlu1 %341 }
  0xbe   :  { %v141_v33 = vpop.f32.mrf.mxu0 }
  0xbf   :  { %v142_v40 = vadd.f32 %v141_v33, %v46_v35 }
  0xc6   :  { %v144_v34 = vpop.f32.mrf.mxu0 }
  0xc7   :  { %v145_v39 = vadd.f32 %v144_v34, %v51_v38  ;;  %v267_v34 = vpop.permute.xlu0 %266 }
  0xc9   :  { %v153_v43 = vpack.c.bf16 %v145_v39, %v142_v40 }
  0xcb   :  { %v155_v47 = vunpack.c.l.bf16 %v153_v43  ;;  %v156_v50 = vunpack.c.h.bf16 %v153_v43 }
  0xce   :  { %v147_v37 = vpop.f32.mrf.mxu0 }
  0xcf   :  { %v148_v44 = vadd.f32 %v147_v37, %v56_v36  ;;  %v337_v54 = vpop.permute.xlu0 %336 }
  0xd6   :  { %v150_v42 = vpop.f32.mrf.mxu0 }
  0xd7   :  { %v151_v45 = vadd.f32 %v150_v42, %v61_v41 }
  0xd9   :  { %v154_v46 = vpack.c.bf16 %v151_v45, %v148_v44 }
  0xdb   :  { %v157_v48 = vunpack.c.l.bf16 %v154_v46  ;;  %v158_v49 = vunpack.c.h.bf16 %v154_v46 }
  0xdd   :  { %493 = vtanh.f32 %v157_v48 }
  0xde   :  { %495 = vtanh.f32 %v158_v49 }
  0xdf   :  { %497 = vtanh.f32 %v155_v47 }
  0xe0   :  { %499 = vtanh.f32 %v156_v50  ;;  %v486_v50 = vld [vmem:[%s742_s2 + $0x20] sm:$0xff] }
  0xe3   :  { %v494_v52 = vpop.eup %493 }
  0xe4   :  { %v496_v53 = vpop.eup %495 }
  0xe5   :  { %v498_v55 = vpop.eup %497  ;;  %v164_v56 = vpack.c.bf16 %v496_v53, %v494_v52 }
  0xe6   :  { %v500_v57 = vpop.eup %499 }
  0xe7   :  { %216 = vmatpush.bf16.msra.mxu1 %v164_v56  ;;  %v163_v58 = vpack.c.bf16 %v500_v57, %v498_v55  ;;  %v332_v56 = vpop.permute.xlu0 %331 }
  0xeb   :  { %217 = vmatpush.bf16.msra.mxu1 %v163_v58  ;;  %v327_v58 = vpop.permute.xlu2 %326 }
  0xee   :  { %459 = vmatmul.msk.bf16.vlgmr.msra.gmra.mxu1 %vm203_vm1, %v482_v59 }
  0xfe   :  { %460 = vmatmul.msk.bf16.gmra.mxu1 %vm203_vm1, %v483_v62 }
 0x16b   :  { %v219_v0 = vpop.f32.mrf.mxu1 }
 0x16c   :  { %v220_v7 = vadd.f32 %v219_v0, %v176_v6 }
 0x173   :  { %v221_v1 = vpop.f32.mrf.mxu1 }
 0x174   :  { %v222_v5 = vadd.f32 %v221_v1, %v181_v4 }
 0x176   :  { %v229_v10 = vpack.c.bf16 %v222_v5, %v220_v7 }
 0x178   :  { %v231_v14 = vunpack.c.l.bf16 %v229_v10  ;;  %v232_v17 = vunpack.c.h.bf16 %v229_v10 }
 0x17b   :  { %v224_v3 = vpop.f32.mrf.mxu1 }
 0x17c   :  { %v225_v11 = vadd.f32 %v224_v3, %v186_v2 }
 0x183   :  { %v226_v9 = vpop.f32.mrf.mxu1 }
 0x184   :  { %v227_v12 = vadd.f32 %v226_v9, %v191_v8 }
 0x186   :  { %v230_v13 = vpack.c.bf16 %v227_v12, %v225_v11  ;;  %v391_v12 = vld [vmem:[%s742_s2 + $0x30] sm:$0x1] }
 0x188   :  { %v233_v15 = vunpack.c.l.bf16 %v230_v13  ;;  %v234_v16 = vunpack.c.h.bf16 %v230_v13  ;;  %v396_v13 = vpop.permute.xlu1 %395 }
 0x18a   :  { %501 = vtanh.f32 %v233_v15 }
 0x18b   :  { %503 = vtanh.f32 %v234_v16 }
 0x18c   :  { %505 = vtanh.f32 %v231_v14 }
 0x18d   :  { %507 = vtanh.f32 %v232_v17 }
 0x190   :  { %v502_v18 = vpop.eup %501 }
 0x191   :  { %v504_v19 = vpop.eup %503 }
 0x192   :  { %v506_v20 = vpop.eup %505  ;;  %v240_v21 = vpack.c.bf16 %v504_v19, %v502_v18 }
 0x193   :  { %v508_v22 = vpop.eup %507 }
 0x194   :  { %291 = vmatpush.bf16.msra.mxu2 %v240_v21  ;;  %v239_v23 = vpack.c.bf16 %v508_v22, %v506_v20 }
 0x198   :  { %292 = vmatpush.bf16.msra.mxu2 %v239_v23 }
 0x19b   :  { %469 = vmatmul.msk.bf16.vlgmr.msra.gmra.mxu2 %vm203_vm1, %v484_v24 }
 0x1ab   :  { %470 = vmatmul.msk.bf16.gmra.mxu2 %vm203_vm1, %v485_v25 }
 0x21e   :  { %v294_v26 = vpop.f32.mrf.mxu2 }
 0x21f   :  { %v295_v33 = vadd.f32 %v294_v26, %v252_v32 }
 0x226   :  { %v296_v27 = vpop.f32.mrf.mxu2 }
 0x227   :  { %v297_v31 = vadd.f32 %v296_v27, %v257_v30 }
 0x229   :  { %v304_v36 = vpack.c.bf16 %v297_v31, %v295_v33 }
 0x22b   :  { %v306_v40 = vunpack.c.l.bf16 %v304_v36  ;;  %v307_v43 = vunpack.c.h.bf16 %v304_v36 }
 0x22e   :  { %v299_v29 = vpop.f32.mrf.mxu2 }
 0x22f   :  { %v300_v37 = vadd.f32 %v299_v29, %v262_v28 }
 0x236   :  { %v301_v35 = vpop.f32.mrf.mxu2 }
 0x237   :  { %v302_v38 = vadd.f32 %v301_v35, %v267_v34 }
 0x239   :  { %v305_v39 = vpack.c.bf16 %v302_v38, %v300_v37 }
 0x23b   :  { %v308_v41 = vunpack.c.l.bf16 %v305_v39  ;;  %v309_v42 = vunpack.c.h.bf16 %v305_v39 }
 0x23d   :  { %509 = vtanh.f32 %v308_v41 }
 0x23e   :  { %511 = vtanh.f32 %v309_v42 }
 0x23f   :  { %513 = vtanh.f32 %v306_v40 }
 0x240   :  { %515 = vtanh.f32 %v307_v43 }
 0x243   :  { %v510_v44 = vpop.eup %509 }
 0x244   :  { %v512_v45 = vpop.eup %511 }
 0x245   :  { %v514_v46 = vpop.eup %513  ;;  %v315_v47 = vpack.c.bf16 %v512_v45, %v510_v44 }
 0x246   :  { %v516_v48 = vpop.eup %515 }
 0x247   :  { %366 = vmatpush.bf16.msra.mxu3 %v315_v47  ;;  %v314_v49 = vpack.c.bf16 %v516_v48, %v514_v46 }
 0x24b   :  { %367 = vmatpush.bf16.msra.mxu3 %v314_v49 }
 0x24e   :  { %479 = vmatmul.msk.bf16.vlgmr.msra.gmra.mxu3 %vm203_vm1, %v486_v50 }
 0x25e   :  { %480 = vmatmul.msk.bf16.gmra.mxu3 %vm203_vm1, %v487_v51 }
 0x2d1   :  { %v369_v52 = vpop.f32.mrf.mxu3 }
 0x2d2   :  { %v370_v59 = vadd.f32 %v369_v52, %v327_v58 }
 0x2d9   :  { %v371_v53 = vpop.f32.mrf.mxu3 }
 0x2da   :  { %v372_v57 = vadd.f32 %v371_v53, %v332_v56 }
 0x2dc   :  { %v379_v62 = vpack.c.bf16 %v372_v57, %v370_v59 }
 0x2de   :  { %v381_v2 = vunpack.c.l.bf16 %v379_v62  ;;  %v382_v5 = vunpack.c.h.bf16 %v379_v62 }
 0x2e1   :  { %v374_v55 = vpop.f32.mrf.mxu3 }
 0x2e2   :  { %v375_v63 = vadd.f32 %v374_v55, %v337_v54 }
 0x2e9   :  { %v376_v61 = vpop.f32.mrf.mxu3 }
 0x2ea   :  { %v377_v0 = vadd.f32 %v376_v61, %v342_v60 }
 0x2ec   :  { %v380_v1 = vpack.c.bf16 %v377_v0, %v375_v63 }
 0x2ee   :  { %v383_v3 = vunpack.c.l.bf16 %v380_v1  ;;  %v384_v4 = vunpack.c.h.bf16 %v380_v1 }
 0x2f0   :  { %517 = vtanh.f32 %v383_v3 }
 0x2f1   :  { %519 = vtanh.f32 %v384_v4 }
 0x2f2   :  { %521 = vtanh.f32 %v381_v2 }
 0x2f3   :  { %523 = vtanh.f32 %v382_v5 }
 0x2f6   :  { %v518_v6 = vpop.eup %517 }
 0x2f7   :  { %v520_v7 = vpop.eup %519 }
 0x2f8   :  { %v522_v8 = vpop.eup %521  ;;  %v390_v9 = vpack.c.bf16 %v520_v7, %v518_v6 }
 0x2f9   :  { %v524_v10 = vpop.eup %523 }
 0x2fa   :  { %407 = vmatpush.bf16.msrb.mxu1 %v390_v9  ;;  %v389_v11 = vpack.c.bf16 %v524_v10, %v522_v8 }
 0x2fe   :  { %408 = vmatpush.bf16.msrb.mxu1 %v389_v11 }
 0x301   :  { %481 = vmatmul.msk.bf16.vlgmr.msrb.gmra.mxu1 %vm203_vm1, %v391_v12 }
 0x37e   :  { %v410_v14 = vpop.f32.mrf.mxu1 }
 0x37f   :  { %v411_v15 = vadd.f32 %v410_v14, %v396_v13 }
 0x381   :  { %414 = vst [vmem:[#allocation2] sm:$0x1] %v411_v15 }
 0x382   :  { %425 = dma.vmem_to_hbm [thread:$0]  %s421_s0, 16, %s423_s25, [#allocation3]  }
 0x386   :  { %v412_v16 = vpop.f32.mrf.mxu1 }
 0x387   :  { %549 = dma.done.wait [#allocation3], 16  }
 0x388   :  { %550 = vsyncadd [#allocation3], 4294967280 }
 0x389   :  { %430 = vsyncpa [#allocation3], 1 }

</bundles_post_ra>
